<compile_context>
chip_gen: v7x
topology: tpu7x:2x2x1
jax: 0.10.0
libtpu: 0.0.40
codegen_flags: <defaults>
</compile_context>

<pallas_src>
import jax
import jax.numpy as jnp
from jax.experimental import pallas as pl
from jax.experimental.pallas import tpu as pltpu


def dynamics_kernel(x_ref, wf_ref, bf_ref, w1_ref, b1_ref, wo_ref, bo_ref, o_ref):
    """Fused MLP forward for one batch tile: 3 matmuls + biases + 2 ReLUs.

    W_in/W0 are folded offline, so:
        h = relu(x @ W_fused + b_fused)   # == relu((x @ W_in + b_in) @ W0 + b0)
        h = relu(h @ W1 + b1)
        y = h @ W_out + b_out
    Dots accumulate in f32; bias-add/ReLU run on the f32 accumulator (biases are
    stored f32), downcasting to the weight dtype only for the next MXU operand.
    """
    wdt = wf_ref.dtype
    x = x_ref[...].astype(wdt)
    h = jnp.dot(x, wf_ref[...], preferred_element_type=jnp.float32) + bf_ref[...]
    h = jnp.maximum(h, 0.0).astype(wdt)
    h = jnp.dot(h, w1_ref[...], preferred_element_type=jnp.float32) + b1_ref[...]
    h = jnp.maximum(h, 0.0).astype(wdt)
    y = jnp.dot(h, wo_ref[...], preferred_element_type=jnp.float32) + bo_ref[...]
    o_ref[...] = y.astype(o_ref.dtype)


def _round_up(n, m):
    return ((n + m - 1) // m) * m


def pack_params(params, *, compute_dtype=None):
    """One-time parameter packing (hoisted out of the per-call forward path).

    * Fuses input_layer into h0 in f32 (exact: no activation between them).
    * Zero-pads the output layer to a lane-dense width (multiple of 128).
    * Casts weights to `compute_dtype` (bf16 by default for large hidden sizes,
      f32 for small ones); biases are kept in f32 for the f32 epilogue.
    """
    w_in, b_in, w0, b0, w1, b1, w_out, b_out = params
    D, H = w_in.shape
    O = w_out.shape[1]
    if compute_dtype is None:
        compute_dtype = jnp.bfloat16 if H >= 1024 else jnp.float32

    w_fused = w_in.astype(jnp.float32) @ w0.astype(jnp.float32)
    b_fused = b_in.astype(jnp.float32) @ w0.astype(jnp.float32) + b0.astype(jnp.float32)

    O_pad = _round_up(O, 128)
    w_out_p = jnp.zeros((H, O_pad), jnp.float32).at[:, :O].set(w_out.astype(jnp.float32))
    b_out_p = jnp.zeros((1, O_pad), jnp.float32).at[:, :O].set(b_out.astype(jnp.float32))

    return (
        w_fused.astype(compute_dtype),        # (D, H)
        b_fused.reshape(1, H),                # (1, H)  f32
        w1.astype(compute_dtype),             # (H, H)
        b1.astype(jnp.float32).reshape(1, H),  # (1, H)  f32
        w_out_p.astype(compute_dtype),        # (H, O_pad)
        b_out_p,                              # (1, O_pad) f32
        int(O),
    )


def _choose_tb(B, D, H, O_pad, weight_bytes, x_itemsize):
    """Largest batch tile that fits the VMEM budget; single grid step if possible."""
    B8 = _round_up(max(B, 1), 8)
    budget = 40 << 20                        # conservative vs. v7x's 64 MiB VMEM
    per_row = 2 * (D + O_pad) * x_itemsize + 3 * H * 4   # 2x-buffered io + f32 acts
    avail = max(budget - 2 * weight_bytes, per_row * 8)
    max_rows = avail // per_row
    tb = min(B8, 1024, max_rows)
    if tb >= B8:
        return int(B8)                       # whole batch in one grid step
    if tb >= 256:
        return int((tb // 256) * 256)        # MXU-friendly LHS depth
    return int(max(8, (tb // 8) * 8))


def dynamics_net_forward(x, packed, *, tb=None):
    """Pallas forward. x: (B, input_dim); `packed` from pack_params()."""
    w_fused, b_fused, w1, b1, w_out_p, b_out_p, out_dim = packed
    B, D = x.shape
    H = w_fused.shape[1]
    O_pad = w_out_p.shape[1]

    weights = (w_fused, b_fused, w1, b1, w_out_p, b_out_p)
    weight_bytes = sum(int(a.size) * a.dtype.itemsize for a in weights)

    if tb is None:
        tb = _choose_tb(B, D, H, O_pad, weight_bytes, x.dtype.itemsize)
    tb = max(8, _round_up(int(tb), 8))
    B_pad = _round_up(B, tb)
    x_p = x if B_pad == B else jnp.zeros((B_pad, D), x.dtype).at[:B].set(x)
    grid = (B_pad // tb,)

    # VMEM sizing: weights (worst case double-buffered) + double-buffered io
    # tiles + rough f32 activation chain, 1.5x headroom, clamped to 64 MiB so
    # the limit is valid on every TPU generation.
    tile_bytes = 2 * tb * (D + O_pad) * x.dtype.itemsize
    act_bytes = 3 * tb * H * 4
    vmem_limit = int(min(max((2 * weight_bytes + tile_bytes + act_bytes) * 3 // 2,
                             8 << 20), 64 << 20))

    flops = 2 * B_pad * (D * H + H * H + H * O_pad)
    bytes_accessed = (weight_bytes
                      + int(x_p.size) * x_p.dtype.itemsize
                      + B_pad * O_pad * x.dtype.itemsize)

    batch_map = lambda i: (i, 0)
    fixed_map = lambda i: (0, 0)

    def build(single_buffer_weights):
        pm = pl.Buffered(1) if single_buffer_weights else None

        def fixed_spec(shape):
            if pm is None:
                return pl.BlockSpec(shape, fixed_map)
            return pl.BlockSpec(shape, fixed_map, pipeline_mode=pm)

        in_specs = [
            pl.BlockSpec((tb, D), batch_map),   # x tile (double-buffered)
            fixed_spec((D, H)),                 # W_fused = W_in @ W0
            fixed_spec((1, H)),                 # b_fused
            fixed_spec((H, H)),                 # W1
            fixed_spec((1, H)),                 # b1
            fixed_spec((H, O_pad)),             # W_out (lane-padded)
            fixed_spec((1, O_pad)),             # b_out (lane-padded)
        ]
        out_specs = pl.BlockSpec((tb, O_pad), batch_map)
        return pl.pallas_call(
            dynamics_kernel,
            out_shape=jax.ShapeDtypeStruct((B_pad, O_pad), x.dtype),
            grid_spec=pl.GridSpec(grid=grid, in_specs=in_specs, out_specs=out_specs),
            compiler_params=pltpu.CompilerParams(
                dimension_semantics=("parallel",),
                vmem_limit_bytes=vmem_limit,
            ),
            cost_estimate=pl.CostEstimate(
                flops=flops, transcendentals=0, bytes_accessed=bytes_accessed),
        )

    args = (x_p, w_fused, b_fused, w1, b1, w_out_p, b_out_p)
    try:
        y_pad = build(True)(*args)
    except Exception:
        # pl.Buffered / pipeline_mode unsupported on this JAX version:
        # fall back to default (double-buffered) weight specs.
        y_pad = build(False)(*args)

    return y_pad[:B, :out_dim]


def init_params(key, input_dim, output_dim, n_neurons, dtype=jnp.float32):
    """Deterministic init mimicking PyTorch nn.Linear default U(-1/sqrt(fan_in), ...).
    Weights stored as (in_features, out_features)."""
    def linear(k, fan_in, fan_out):
        kw, kb = jax.random.split(k)
        bound = 1.0 / jnp.sqrt(fan_in)
        w = jax.random.uniform(kw, (fan_in, fan_out), dtype, -bound, bound)
        b = jax.random.uniform(kb, (1, fan_out), dtype, -bound, bound)
        return w, b

    k0, k1, k2, k3 = jax.random.split(key, 4)
    w_in, b_in = linear(k0, input_dim, n_neurons)
    w0, b0 = linear(k1, n_neurons, n_neurons)
    w1, b1 = linear(k2, n_neurons, n_neurons)
    w_out, b_out = linear(k3, n_neurons, output_dim)
    return (w_in, b_in, w0, b0, w1, b1, w_out, b_out)


def reference_forward(x, params):
    """Unfused reference matching the PyTorch module exactly."""
    w_in, b_in, w0, b0, w1, b1, w_out, b_out = params
    h = x @ w_in + b_in                      # input_layer (no activation)
    h = jnp.maximum(h @ w0 + b0, 0.0)        # h0 + ReLU
    h = jnp.maximum(h @ w1 + b1, 0.0)        # h1 + ReLU
    return h @ w_out + b_out                 # output_layer


if __name__ == "__main__":
    # Small shapes consistent with the module's forward: x is (batch, input_dim).
    batch, input_dim, output_dim, n_neurons = 16, 16, 8, 128

    key = jax.random.PRNGKey(0)
    kx, kp = jax.random.split(key)
    x = jax.random.normal(kx, (batch, input_dim), dtype=jnp.float32)
    params = init_params(kp, input_dim, output_dim, n_neurons)

    packed = pack_params(params)             # one-time fuse + pad, hoisted out of forward
    y = dynamics_net_forward(x, packed)
    y = jax.block_until_ready(y)

    y_ref = reference_forward(x, params)
    assert y.shape == (batch, output_dim)
    assert jnp.allclose(y, y_ref, atol=1e-4, rtol=1e-4), "mismatch vs reference"

    print("KERNEL_OK")
</pallas_src>

<mosaic_0001>
module attributes {stable_mosaic.version = 11 : i64} {
  func.func @dynamics_kernel(%arg0: i32, %arg1: memref<16x16xf32, #tpu.memory_space<vmem>>, %arg2: memref<16x128xf32, #tpu.memory_space<vmem>>, %arg3: memref<1x128xf32, #tpu.memory_space<vmem>>, %arg4: memref<128x128xf32, #tpu.memory_space<vmem>>, %arg5: memref<1x128xf32, #tpu.memory_space<vmem>>, %arg6: memref<128x128xf32, #tpu.memory_space<vmem>>, %arg7: memref<1x128xf32, #tpu.memory_space<vmem>>, %arg8: memref<16x128xf32, #tpu.memory_space<vmem>>) attributes {dimension_semantics = [#tpu.dimension_semantics<parallel>], iteration_bounds = array<i64: 1>, scalar_prefetch = 0 : i64, scratch_operands = 0 : i64, tpu.core_type = #tpu.core_type<tc>, window_params = [{transform_indices = @transform_0, window_bounds = array<i64: 16, 16>}, {pipeline_mode = #tpu.pipeline_mode<synchronous>, transform_indices = @transform_1, window_bounds = array<i64: 16, 128>}, {pipeline_mode = #tpu.pipeline_mode<synchronous>, transform_indices = @transform_2, window_bounds = array<i64: 1, 128>}, {pipeline_mode = #tpu.pipeline_mode<synchronous>, transform_indices = @transform_3, window_bounds = array<i64: 128, 128>}, {pipeline_mode = #tpu.pipeline_mode<synchronous>, transform_indices = @transform_4, window_bounds = array<i64: 1, 128>}, {pipeline_mode = #tpu.pipeline_mode<synchronous>, transform_indices = @transform_5, window_bounds = array<i64: 128, 128>}, {pipeline_mode = #tpu.pipeline_mode<synchronous>, transform_indices = @transform_6, window_bounds = array<i64: 1, 128>}, {transform_indices = @transform_7, window_bounds = array<i64: 16, 128>}]} {
    %c0 = arith.constant 0 : index
    %c0_0 = arith.constant 0 : index
    %0 = vector.load %arg1[%c0, %c0_0] : memref<16x16xf32, #tpu.memory_space<vmem>>, vector<16x16xf32>
    %c0_1 = arith.constant 0 : index
    %c0_2 = arith.constant 0 : index
    %1 = vector.load %arg2[%c0_1, %c0_2] : memref<16x128xf32, #tpu.memory_space<vmem>>, vector<16x128xf32>
    %cst = arith.constant dense<0.000000e+00> : vector<16x128xf32>
    %2 = tpu.matmul %0, %1, %cst {dimension_numbers = #tpu.dot_dimension_numbers<[1], [0], [0], [1], [0, 0, 1, 1], [], []>} : vector<16x16xf32>, vector<16x128xf32>, vector<16x128xf32> -> vector<16x128xf32>
    %c0_3 = arith.constant 0 : index
    %c0_4 = arith.constant 0 : index
    %3 = vector.load %arg3[%c0_3, %c0_4] : memref<1x128xf32, #tpu.memory_space<vmem>>, vector<1x128xf32>
    %4 = vector.broadcast %3 : vector<1x128xf32> to vector<16x128xf32>
    %5 = arith.addf %2, %4 : vector<16x128xf32>
    %cst_5 = arith.constant 0.000000e+00 : f32
    %6 = vector.broadcast %cst_5 : f32 to vector<16x128xf32>
    %7 = arith.maximumf %5, %6 : vector<16x128xf32>
    %c0_6 = arith.constant 0 : index
    %c0_7 = arith.constant 0 : index
    %8 = vector.load %arg4[%c0_6, %c0_7] : memref<128x128xf32, #tpu.memory_space<vmem>>, vector<128x128xf32>
    %cst_8 = arith.constant dense<0.000000e+00> : vector<16x128xf32>
    %9 = tpu.matmul %7, %8, %cst_8 {dimension_numbers = #tpu.dot_dimension_numbers<[1], [0], [0], [1], [0, 0, 1, 1], [], []>} : vector<16x128xf32>, vector<128x128xf32>, vector<16x128xf32> -> vector<16x128xf32>
    %c0_9 = arith.constant 0 : index
    %c0_10 = arith.constant 0 : index
    %10 = vector.load %arg5[%c0_9, %c0_10] : memref<1x128xf32, #tpu.memory_space<vmem>>, vector<1x128xf32>
    %11 = vector.broadcast %10 : vector<1x128xf32> to vector<16x128xf32>
    %12 = arith.addf %9, %11 : vector<16x128xf32>
    %cst_11 = arith.constant 0.000000e+00 : f32
    %13 = vector.broadcast %cst_11 : f32 to vector<16x128xf32>
    %14 = arith.maximumf %12, %13 : vector<16x128xf32>
    %c0_12 = arith.constant 0 : index
    %c0_13 = arith.constant 0 : index
    %15 = vector.load %arg6[%c0_12, %c0_13] : memref<128x128xf32, #tpu.memory_space<vmem>>, vector<128x128xf32>
    %cst_14 = arith.constant dense<0.000000e+00> : vector<16x128xf32>
    %16 = tpu.matmul %14, %15, %cst_14 {dimension_numbers = #tpu.dot_dimension_numbers<[1], [0], [0], [1], [0, 0, 1, 1], [], []>} : vector<16x128xf32>, vector<128x128xf32>, vector<16x128xf32> -> vector<16x128xf32>
    %c0_15 = arith.constant 0 : index
    %c0_16 = arith.constant 0 : index
    %17 = vector.load %arg7[%c0_15, %c0_16] : memref<1x128xf32, #tpu.memory_space<vmem>>, vector<1x128xf32>
    %18 = vector.broadcast %17 : vector<1x128xf32> to vector<16x128xf32>
    %19 = arith.addf %16, %18 : vector<16x128xf32>
    %c0_17 = arith.constant 0 : index
    %c0_18 = arith.constant 0 : index
    %20 = vector.load %arg8[%c0_17, %c0_18] : memref<16x128xf32, #tpu.memory_space<vmem>>, vector<16x128xf32>
    tpu.vector_store %arg8[%c0_17, %c0_18], %19 {strides = array<i32>} : memref<16x128xf32, #tpu.memory_space<vmem>>, vector<16x128xf32>,
    return
  }
  func.func @transform_0(%arg0: i32) -> (i32, i32) {
    %c0_i32 = arith.constant 0 : i32
    %c0_i32_0 = arith.constant 0 : i32
    return %arg0, %c0_i32 : i32, i32
  }
  func.func @transform_1(%arg0: i32) -> (i32, i32) {
    %c0_i32 = arith.constant 0 : i32
    %c0_i32_0 = arith.constant 0 : i32
    %c0_i32_1 = arith.constant 0 : i32
    return %c0_i32, %c0_i32_0 : i32, i32
  }
  func.func @transform_2(%arg0: i32) -> (i32, i32) {
    %c0_i32 = arith.constant 0 : i32
    %c0_i32_0 = arith.constant 0 : i32
    %c0_i32_1 = arith.constant 0 : i32
    return %c0_i32, %c0_i32_0 : i32, i32
  }
  func.func @transform_3(%arg0: i32) -> (i32, i32) {
    %c0_i32 = arith.constant 0 : i32
    %c0_i32_0 = arith.constant 0 : i32
    %c0_i32_1 = arith.constant 0 : i32
    return %c0_i32, %c0_i32_0 : i32, i32
  }
  func.func @transform_4(%arg0: i32) -> (i32, i32) {
    %c0_i32 = arith.constant 0 : i32
    %c0_i32_0 = arith.constant 0 : i32
    %c0_i32_1 = arith.constant 0 : i32
    return %c0_i32, %c0_i32_0 : i32, i32
  }
  func.func @transform_5(%arg0: i32) -> (i32, i32) {
    %c0_i32 = arith.constant 0 : i32
    %c0_i32_0 = arith.constant 0 : i32
    %c0_i32_1 = arith.constant 0 : i32
    return %c0_i32, %c0_i32_0 : i32, i32
  }
  func.func @transform_6(%arg0: i32) -> (i32, i32) {
    %c0_i32 = arith.constant 0 : i32
    %c0_i32_0 = arith.constant 0 : i32
    %c0_i32_1 = arith.constant 0 : i32
    return %c0_i32, %c0_i32_0 : i32, i32
  }
  func.func @transform_7(%arg0: i32) -> (i32, i32) {
    %c0_i32 = arith.constant 0 : i32
    %c0_i32_0 = arith.constant 0 : i32
    return %arg0, %c0_i32 : i32, i32
  }
}

module attributes {stable_mosaic.version = 11 : i64} {
  func.func @dynamics_kernel(%arg0: i32, %arg1: memref<16x16xf32, #tpu.memory_space<vmem>>, %arg2: memref<16x128xf32, #tpu.memory_space<vmem>>, %arg3: memref<1x128xf32, #tpu.memory_space<vmem>>, %arg4: memref<128x128xf32, #tpu.memory_space<vmem>>, %arg5: memref<1x128xf32, #tpu.memory_space<vmem>>, %arg6: memref<128x128xf32, #tpu.memory_space<vmem>>, %arg7: memref<1x128xf32, #tpu.memory_space<vmem>>, %arg8: memref<16x128xf32, #tpu.memory_space<vmem>>) attributes {dimension_semantics = [#tpu.dimension_semantics<parallel>], iteration_bounds = array<i64: 1>, scalar_prefetch = 0 : i64, scratch_operands = 0 : i64, tpu.core_type = #tpu.core_type<tc>, window_params = [{transform_indices = @transform_0, window_bounds = array<i64: 16, 16>}, {pipeline_mode = #tpu.pipeline_mode<synchronous>, transform_indices = @transform_1, window_bounds = array<i64: 16, 128>}, {pipeline_mode = #tpu.pipeline_mode<synchronous>, transform_indices = @transform_2, window_bounds = array<i64: 1, 128>}, {pipeline_mode = #tpu.pipeline_mode<synchronous>, transform_indices = @transform_3, window_bounds = array<i64: 128, 128>}, {pipeline_mode = #tpu.pipeline_mode<synchronous>, transform_indices = @transform_4, window_bounds = array<i64: 1, 128>}, {pipeline_mode = #tpu.pipeline_mode<synchronous>, transform_indices = @transform_5, window_bounds = array<i64: 128, 128>}, {pipeline_mode = #tpu.pipeline_mode<synchronous>, transform_indices = @transform_6, window_bounds = array<i64: 1, 128>}, {transform_indices = @transform_7, window_bounds = array<i64: 16, 128>}]} {
    %c0 = arith.constant 0 : index
    %c0_0 = arith.constant 0 : index
    %0 = vector.load %arg1[%c0, %c0_0] : memref<16x16xf32, #tpu.memory_space<vmem>>, vector<16x16xf32>
    %c0_1 = arith.constant 0 : index
    %c0_2 = arith.constant 0 : index
    %1 = vector.load %arg2[%c0_1, %c0_2] : memref<16x128xf32, #tpu.memory_space<vmem>>, vector<16x128xf32>
    %cst = arith.constant dense<0.000000e+00> : vector<16x128xf32>
    %2 = tpu.matmul %0, %1, %cst {dimension_numbers = #tpu.dot_dimension_numbers<[1], [0], [0], [1], [0, 0, 1, 1], [], []>} : vector<16x16xf32>, vector<16x128xf32>, vector<16x128xf32> -> vector<16x128xf32>
    %c0_3 = arith.constant 0 : index
    %c0_4 = arith.constant 0 : index
    %3 = vector.load %arg3[%c0_3, %c0_4] : memref<1x128xf32, #tpu.memory_space<vmem>>, vector<1x128xf32>
    %4 = vector.broadcast %3 : vector<1x128xf32> to vector<16x128xf32>
    %5 = arith.addf %2, %4 : vector<16x128xf32>
    %cst_5 = arith.constant 0.000000e+00 : f32
    %6 = vector.broadcast %cst_5 : f32 to vector<16x128xf32>
    %7 = arith.maximumf %5, %6 : vector<16x128xf32>
    %c0_6 = arith.constant 0 : index
    %c0_7 = arith.constant 0 : index
    %8 = vector.load %arg4[%c0_6, %c0_7] : memref<128x128xf32, #tpu.memory_space<vmem>>, vector<128x128xf32>
    %cst_8 = arith.constant dense<0.000000e+00> : vector<16x128xf32>
    %9 = tpu.matmul %7, %8, %cst_8 {dimension_numbers = #tpu.dot_dimension_numbers<[1], [0], [0], [1], [0, 0, 1, 1], [], []>} : vector<16x128xf32>, vector<128x128xf32>, vector<16x128xf32> -> vector<16x128xf32>
    %c0_9 = arith.constant 0 : index
    %c0_10 = arith.constant 0 : index
    %10 = vector.load %arg5[%c0_9, %c0_10] : memref<1x128xf32, #tpu.memory_space<vmem>>, vector<1x128xf32>
    %11 = vector.broadcast %10 : vector<1x128xf32> to vector<16x128xf32>
    %12 = arith.addf %9, %11 : vector<16x128xf32>
    %cst_11 = arith.constant 0.000000e+00 : f32
    %13 = vector.broadcast %cst_11 : f32 to vector<16x128xf32>
    %14 = arith.maximumf %12, %13 : vector<16x128xf32>
    %c0_12 = arith.constant 0 : index
    %c0_13 = arith.constant 0 : index
    %15 = vector.load %arg6[%c0_12, %c0_13] : memref<128x128xf32, #tpu.memory_space<vmem>>, vector<128x128xf32>
    %cst_14 = arith.constant dense<0.000000e+00> : vector<16x128xf32>
    %16 = tpu.matmul %14, %15, %cst_14 {dimension_numbers = #tpu.dot_dimension_numbers<[1], [0], [0], [1], [0, 0, 1, 1], [], []>} : vector<16x128xf32>, vector<128x128xf32>, vector<16x128xf32> -> vector<16x128xf32>
    %c0_15 = arith.constant 0 : index
    %c0_16 = arith.constant 0 : index
    %17 = vector.load %arg7[%c0_15, %c0_16] : memref<1x128xf32, #tpu.memory_space<vmem>>, vector<1x128xf32>
    %18 = vector.broadcast %17 : vector<1x128xf32> to vector<16x128xf32>
    %19 = arith.addf %16, %18 : vector<16x128xf32>
    %c0_17 = arith.constant 0 : index
    %c0_18 = arith.constant 0 : index
    %20 = vector.load %arg8[%c0_17, %c0_18] : memref<16x128xf32, #tpu.memory_space<vmem>>, vector<16x128xf32>
    tpu.vector_store %arg8[%c0_17, %c0_18], %19 {strides = array<i32>} : memref<16x128xf32, #tpu.memory_space<vmem>>, vector<16x128xf32>,
    return
  }
  func.func @transform_0(%arg0: i32) -> (i32, i32) {
    %c0_i32 = arith.constant 0 : i32
    %c0_i32_0 = arith.constant 0 : i32
    return %arg0, %c0_i32 : i32, i32
  }
  func.func @transform_1(%arg0: i32) -> (i32, i32) {
    %c0_i32 = arith.constant 0 : i32
    %c0_i32_0 = arith.constant 0 : i32
    %c0_i32_1 = arith.constant 0 : i32
    return %c0_i32, %c0_i32_0 : i32, i32
  }
  func.func @transform_2(%arg0: i32) -> (i32, i32) {
    %c0_i32 = arith.constant 0 : i32
    %c0_i32_0 = arith.constant 0 : i32
    %c0_i32_1 = arith.constant 0 : i32
    return %c0_i32, %c0_i32_0 : i32, i32
  }
  func.func @transform_3(%arg0: i32) -> (i32, i32) {
    %c0_i32 = arith.constant 0 : i32
    %c0_i32_0 = arith.constant 0 : i32
    %c0_i32_1 = arith.constant 0 : i32
    return %c0_i32, %c0_i32_0 : i32, i32
  }
  func.func @transform_4(%arg0: i32) -> (i32, i32) {
    %c0_i32 = arith.constant 0 : i32
    %c0_i32_0 = arith.constant 0 : i32
    %c0_i32_1 = arith.constant 0 : i32
    return %c0_i32, %c0_i32_0 : i32, i32
  }
  func.func @transform_5(%arg0: i32) -> (i32, i32) {
    %c0_i32 = arith.constant 0 : i32
    %c0_i32_0 = arith.constant 0 : i32
    %c0_i32_1 = arith.constant 0 : i32
    return %c0_i32, %c0_i32_0 : i32, i32
  }
  func.func @transform_6(%arg0: i32) -> (i32, i32) {
    %c0_i32 = arith.constant 0 : i32
    %c0_i32_0 = arith.constant 0 : i32
    %c0_i32_1 = arith.constant 0 : i32
    return %c0_i32, %c0_i32_0 : i32, i32
  }
  func.func @transform_7(%arg0: i32) -> (i32, i32) {
    %c0_i32 = arith.constant 0 : i32
    %c0_i32_0 = arith.constant 0 : i32
    return %arg0, %c0_i32 : i32, i32
  }
}

</mosaic_0001>

<bundles_post_ra>
// kernel: tpu_custom_call.1
= control target key start
LH: loop header
LB: loop body
LE: loop exit
PB: predicated region body
PF: predicated region fallthrough
CT: control target
= control target key end

     0   :  { %12 = vsyncpa [#allocation3], 0  ;;  %s858_s0 = inlined_call_operand.hbm [shape: f32[16,16], index: 0, kind: input, shape index: {}]   ;;  %s859_s1 = inlined_call_operand.hbm [shape: f32[16,128], index: 1, kind: input, shape index: {}]   ;;  %s860_s2 = inlined_call_operand.vmem [shape: f32[1,128], index: 2, kind: input, shape index: {}]   ;;  %s861_s3 = inlined_call_operand.hbm [shape: f32[128,128], index: 3, kind: input, shape index: {}]   ;;  %s862_s4 = inlined_call_operand.vmem [shape: f32[1,128], index: 4, kind: input, shape index: {}]   ;;  %s863_s5 = inlined_call_operand.hbm [shape: f32[128,128], index: 5, kind: input, shape index: {}]   ;;  %s864_s6 = inlined_call_operand.vmem [shape: f32[1,128], index: 6, kind: input, shape index: {}]   ;;  %s865_s7 = inlined_call_operand.hbm [shape: f32[16,128], index: 7, kind: output, shape index: {}]  }
   0x1   :  { %13 = vsyncpa [#allocation6], 0 }
   0x2   :  { %14 = vsyncpa [#allocation9], 0 }
   0x3   :  { %15 = vsyncpa [#allocation4], 0  ;;  %s711_s24 = smov [#allocation5]   ;;  %s712_s26 = smov [#allocation2]  }
   0x4   :  { %s33_s25 = sshll.u32 %s711_s24, 4  ;;  %s21_s27 = sshll.u32 %s712_s26, 4  ;;  %s34_s25 = int_to_ptr.vmem [resolvable:$true] %s33_s25  ;;  %s758_s27 = int_to_ptr.vmem [resolvable:$true] %s21_s27 }
   0x5   :  { %s593_s30 = scalar_lea.hbm %s859_s1, 256 }
   0x6   :  { %p594_p0 = scmp.ne.s32.totalorder %s859_s1, %s593_s30  ;;  %p597_p1 = scmp.lt.u32.totalorder %s593_s30, %s859_s1 }
   0x8   :  { %p599_p2 = pnand %p597_p1, %p594_p0 }
   0xa   :  { %602 = shalt.err (!%p599_p2)
}
   0xb   :  { %s603_s12 = scalar_lea.vmem %s34_s25, 256  ;;  %p608_p4 = scmp.lt.s32.totalorder %s34_s25, %s34_s25 }
   0xc   :  { %p604_p3 = scmp.ne.s32.totalorder %s34_s25, %s603_s12  ;;  %p609_p5 = scmp.lt.s32.totalorder %s603_s12, %s603_s12 }
   0xe   :  { %p610_p6 = por %p609_p5, %p608_p4 }
  0x10   :  { %p611_p7 = pnand %p610_p6, %p604_p3 }
  0x12   :  { %614 = shalt.err (!%p611_p7)
}
  0x13   :  { %s713_s13 = smov 128   ;;  %s714_s14 = smov 8  }
  0x14   :  { %39 = dma.hbm_to_vmem [thread:$0]  %s859_s1, 256, %s34_s25, [#allocation6], %s713_s13, %s713_s13, %s714_s14  }
  0x15   :  { %s615_s19 = scalar_lea.hbm %s858_s0, 256 }
  0x16   :  { %p616_p8 = scmp.ne.s32.totalorder %s858_s0, %s615_s19  ;;  %p619_p9 = scmp.lt.u32.totalorder %s615_s19, %s858_s0 }
  0x18   :  { %p621_p10 = pnand %p619_p9, %p616_p8 }
  0x1a   :  { %624 = shalt.err (!%p621_p10)
}
  0x1b   :  { %s625_s24 = scalar_lea.vmem %s758_s27, 256  ;;  %p630_p12 = scmp.lt.s32.totalorder %s758_s27, %s758_s27 }
  0x1c   :  { %p626_p11 = scmp.ne.s32.totalorder %s758_s27, %s625_s24  ;;  %p631_p13 = scmp.lt.s32.totalorder %s625_s24, %s625_s24 }
  0x1e   :  { %p632_p0 = por %p631_p13, %p630_p12 }
  0x20   :  { %p633_p1 = pnand %p632_p0, %p626_p11 }
  0x22   :  { %636 = shalt.err (!%p633_p1)
}
  0x23   :  { %27 = dma.hbm_to_vmem [thread:$0]  %s858_s0, 256, %s758_s27, [#allocation3], %s713_s13, %s713_s13, %s714_s14  }
  0x24   :  { %s715_s26 = smov [#allocation7]   ;;  %s716_s29 = smov [#allocation8]  }
  0x25   :  { %s47_s28 = sshll.u32 %s715_s26, 4  ;;  %s61_s30 = sshll.u32 %s716_s29, 4  ;;  %s48_s28 = int_to_ptr.vmem [resolvable:$true] %s47_s28  ;;  %s795_s30 = int_to_ptr.vmem [resolvable:$true] %s61_s30 }
  0x26   :  { %s637_s10 = scalar_lea.hbm %s861_s3, 2048 }
  0x27   :  { %p638_p2 = scmp.ne.s32.totalorder %s861_s3, %s637_s10  ;;  %p641_p3 = scmp.lt.u32.totalorder %s637_s10, %s861_s3 }
  0x29   :  { %p643_p4 = pnand %p641_p3, %p638_p2 }
  0x2b   :  { %646 = shalt.err (!%p643_p4)
}
  0x2c   :  { %s647_s0 = scalar_lea.vmem %s48_s28, 2048  ;;  %p652_p6 = scmp.lt.s32.totalorder %s48_s28, %s48_s28 }
  0x2d   :  { %p648_p5 = scmp.ne.s32.totalorder %s48_s28, %s647_s0  ;;  %p653_p7 = scmp.lt.s32.totalorder %s647_s0, %s647_s0 }
  0x2f   :  { %p654_p8 = por %p653_p7, %p652_p6 }
  0x31   :  { %p655_p9 = pnand %p654_p8, %p648_p5 }
  0x33   :  { %658 = shalt.err (!%p655_p9)
}
  0x34   :  { %53 = dma.hbm_to_vmem [thread:$0]  %s861_s3, 2048, %s48_s28, [#allocation6], %s713_s13, %s713_s13, %s714_s14  }
  0x35   :  { %s659_s20 = scalar_lea.hbm %s863_s5, 2048 }
  0x36   :  { %p660_p10 = scmp.ne.s32.totalorder %s863_s5, %s659_s20  ;;  %p663_p11 = scmp.lt.u32.totalorder %s659_s20, %s863_s5 }
  0x38   :  { %p665_p12 = pnand %p663_p11, %p660_p10 }
  0x3a   :  { %668 = shalt.err (!%p665_p12)
}
  0x3b   :  { %s669_s1 = scalar_lea.vmem %s795_s30, 2048  ;;  %p674_p0 = scmp.lt.s32.totalorder %s795_s30, %s795_s30 }
  0x3c   :  { %p670_p13 = scmp.ne.s32.totalorder %s795_s30, %s669_s1  ;;  %p675_p1 = scmp.lt.s32.totalorder %s669_s1, %s669_s1 }
  0x3e   :  { %p676_p2 = por %p675_p1, %p674_p0 }
  0x40   :  { %p677_p3 = pnand %p676_p2, %p670_p13 }
  0x42   :  { %680 = shalt.err (!%p677_p3)
}
  0x43   :  { %67 = dma.hbm_to_vmem [thread:$0]  %s863_s5, 2048, %s795_s30, [#allocation9], %s713_s13, %s713_s13, %s714_s14  }
  0x44   :  { %703 = dma.done.wait [#allocation3], 256  }
  0x45   :  { %704 = vsyncadd [#allocation3], 4294967040 }
  0x46   :  { %705 = dma.done.wait [#allocation6], 2304  }
  0x47   :  { %706 = vsyncadd [#allocation6], 4294964992 }
  0x48   :  { %707 = dma.done.wait [#allocation9], 2048  }
  0x49   :  { %708 = vsyncadd [#allocation9], 4294965248  ;;  %vm93_vm0 = vcmask 130048   ;;  %v84_v0 = vld [vmem:[#allocation5] sm:$0xff]  ;;  %v85_v1 = vld [vmem:[#allocation5 + $0x8] sm:$0xff]  ;;  %s717_s8 = smov [#allocation10]  }
  0x4a   :  { %v82_v2 = vld [vmem:[#allocation2] sm:$0xff]  ;;  %v518_v3 = vpack.c.bf16 %v85_v1, %v84_v0  ;;  %v178_v5 = vld [vmem:[#allocation7 + $0x8] sm:$0xff]  ;;  %v179_v7 = vld [vmem:[#allocation7 + $0x10] sm:$0xff]  ;;  %s382_s9 = sshll.u32 %s717_s8, 4  ;;  %s383_s9 = int_to_ptr.vmem [resolvable:$true] %s382_s9 }
  0x4b   :  { %445 = vmatprep.mubr.msk.f32.mxu0 %vm93_vm0, %v82_v2  ;;  %v177_v4 = vld [vmem:[#allocation7] sm:$0xff]  ;;  %v180_v8 = vld [vmem:[#allocation7 + $0x18] sm:$0xff]  ;;  %v182_v11 = vld [vmem:[#allocation7 + $0x28] sm:$0xff]  ;;  %p686_p5 = scmp.lt.s32.totalorder %s383_s9, %s383_s9 }
  0x4c   :  { %v522_v6 = vpack.c.bf16 %v178_v5, %v177_v4  ;;  %519 = vmatprep.subr.bf16.mxu0 %v518_v3  ;;  %v526_v9 = vpack.c.bf16 %v180_v8, %v179_v7  ;;  %v181_v10 = vld [vmem:[#allocation7 + $0x20] sm:$0xff]  ;;  %v83_v12 = vld [vmem:[#allocation2 + $0x8] sm:$0xff]  ;;  %v183_v14 = vld [vmem:[#allocation7 + $0x30] sm:$0xff] }
  0x4d   :  { %521 = vmatpush3.bf16.msra.mxu0 %v518_v3  ;;  %v530_v13 = vpack.c.bf16 %v182_v11, %v181_v10  ;;  %v184_v15 = vld [vmem:[#allocation7 + $0x38] sm:$0xff]  ;;  %v185_v17 = vld [vmem:[#allocation7 + $0x40] sm:$0xff]  ;;  %v186_v18 = vld [vmem:[#allocation7 + $0x48] sm:$0xff] }
  0x4e   :  { %523 = vmatprep.subr.bf16.mxu1 %v522_v6  ;;  %v534_v16 = vpack.c.bf16 %v184_v15, %v183_v14  ;;  %v538_v19 = vpack.c.bf16 %v186_v18, %v185_v17  ;;  %v187_v20 = vld [vmem:[#allocation7 + $0x50] sm:$0xff]  ;;  %v188_v21 = vld [vmem:[#allocation7 + $0x58] sm:$0xff]  ;;  %v189_v23 = vld [vmem:[#allocation7 + $0x60] sm:$0xff] }
  0x4f   :  { %525 = vmatpush3.bf16.msra.mxu1 %v522_v6  ;;  %v542_v22 = vpack.c.bf16 %v188_v21, %v187_v20  ;;  %v190_v24 = vld [vmem:[#allocation7 + $0x68] sm:$0xff]  ;;  %v191_v26 = vld [vmem:[#allocation7 + $0x70] sm:$0xff]  ;;  %v192_v27 = vld [vmem:[#allocation7 + $0x78] sm:$0xff] }
  0x50   :  { %527 = vmatprep.subr.bf16.mxu1 %v526_v9  ;;  %446 = vmatmul.mubr.msk.f32.vlgmr.msra.gmra.mrb[0].mxu0 %vm93_vm0, %v83_v12  ;;  %v546_v25 = vpack.c.bf16 %v190_v24, %v189_v23  ;;  %v550_v28 = vpack.c.bf16 %v192_v27, %v191_v26  ;;  %v277_v29 = vld [vmem:[#allocation8] sm:$0xff]  ;;  %v278_v30 = vld [vmem:[#allocation8 + $0x8] sm:$0xff]  ;;  %v279_v31 = vld [vmem:[#allocation8 + $0x10] sm:$0xff] }
  0x51   :  { %v554_v32 = vpack.c.bf16 %v278_v30, %v277_v29  ;;  %v280_v33 = vld [vmem:[#allocation8 + $0x18] sm:$0xff]  ;;  %v281_v35 = vld [vmem:[#allocation8 + $0x20] sm:$0xff]  ;;  %v282_v36 = vld [vmem:[#allocation8 + $0x28] sm:$0xff] }
  0x52   :  { %v558_v34 = vpack.c.bf16 %v280_v33, %v279_v31  ;;  %v562_v37 = vpack.c.bf16 %v282_v36, %v281_v35  ;;  %v283_v38 = vld [vmem:[#allocation8 + $0x30] sm:$0xff]  ;;  %v284_v39 = vld [vmem:[#allocation8 + $0x38] sm:$0xff]  ;;  %v285_v41 = vld [vmem:[#allocation8 + $0x40] sm:$0xff] }
  0x53   :  { %529 = vmatpush3.bf16.msra.mxu1 %v526_v9  ;;  %555 = vmatprep.subr.bf16.mxu0 %v554_v32  ;;  %v566_v40 = vpack.c.bf16 %v284_v39, %v283_v38  ;;  %v286_v42 = vld [vmem:[#allocation8 + $0x48] sm:$0xff]  ;;  %v287_v44 = vld [vmem:[#allocation8 + $0x50] sm:$0xff]  ;;  %v288_v45 = vld [vmem:[#allocation8 + $0x58] sm:$0xff] }
  0x54   :  { %531 = vmatprep.subr.bf16.mxu1 %v530_v13  ;;  %557 = vmatpush3.bf16.msra.mxu0 %v554_v32  ;;  %v570_v43 = vpack.c.bf16 %v286_v42, %v285_v41  ;;  %v574_v46 = vpack.c.bf16 %v288_v45, %v287_v44  ;;  %v289_v47 = vld [vmem:[#allocation8 + $0x60] sm:$0xff]  ;;  %v290_v48 = vld [vmem:[#allocation8 + $0x68] sm:$0xff]  ;;  %v291_v57 = vld [vmem:[#allocation8 + $0x70] sm:$0xff] }
  0x55   :  { %559 = vmatprep.subr.bf16.mxu0 %v558_v34  ;;  %v578_v49 = vpack.c.bf16 %v290_v48, %v289_v47  ;;  %v396_v50 = vld [vmem:[%s860_s2] ss:$0 sm:$0xff]  ;;  %v292_v58 = vld [vmem:[#allocation8 + $0x78] sm:$0xff] }
  0x56   :  { %v582_v59 = vpack.c.bf16 %v292_v58, %v291_v57  ;;  %v399_v60 = vld [vmem:[%s862_s4] ss:$0 sm:$0xff]  ;;  %s681_s4 = scalar_lea.vmem %s383_s9, 256 }
  0x57   :  { %533 = vmatpush3.bf16.msra.mxu1 %v530_v13  ;;  %v400_v3 = vld [vmem:[%s864_s6] ss:$0 sm:$0xff]  ;;  %p682_p4 = scmp.ne.s32.totalorder %s383_s9, %s681_s4  ;;  %p687_p6 = scmp.lt.s32.totalorder %s681_s4, %s681_s4 }
  0x58   :  { %535 = vmatprep.subr.bf16.mxu1 %v534_v16  ;;  %561 = vmatpush3.bf16.msra.mxu0 %v558_v34 }
  0x59   :  { %563 = vmatprep.subr.bf16.mxu0 %v562_v37  ;;  %p688_p7 = por %p687_p6, %p686_p5 }
  0x5b   :  { %537 = vmatpush3.bf16.msra.mxu1 %v534_v16  ;;  %p689_p8 = pnand %p688_p7, %p682_p4 }
  0x5c   :  { %539 = vmatprep.subr.bf16.mxu1 %v538_v19  ;;  %565 = vmatpush3.bf16.msra.mxu0 %v562_v37 }
  0x5d   :  { %567 = vmatprep.subr.bf16.mxu0 %v566_v40 }
  0x5f   :  { %541 = vmatpush3.bf16.msra.mxu1 %v538_v19 }
  0x60   :  { %543 = vmatprep.subr.bf16.mxu1 %v542_v22  ;;  %569 = vmatpush3.bf16.msra.mxu0 %v566_v40 }
  0x61   :  { %571 = vmatprep.subr.bf16.mxu0 %v570_v43 }
  0x63   :  { %545 = vmatpush3.bf16.msra.mxu1 %v542_v22 }
  0x64   :  { %547 = vmatprep.subr.bf16.mxu1 %v546_v25  ;;  %573 = vmatpush3.bf16.msra.mxu0 %v570_v43 }
  0x65   :  { %575 = vmatprep.subr.bf16.mxu0 %v574_v46 }
  0x67   :  { %549 = vmatpush3.bf16.msra.mxu1 %v546_v25 }
  0x68   :  { %551 = vmatprep.subr.bf16.mxu1 %v550_v28  ;;  %577 = vmatpush3.bf16.msra.mxu0 %v574_v46 }
  0x69   :  { %579 = vmatprep.subr.bf16.mxu0 %v578_v49 }
  0x6b   :  { %553 = vmatpush3.bf16.msra.mxu1 %v550_v28 }
  0x6c   :  { %581 = vmatpush3.bf16.msra.mxu0 %v578_v49 }
  0x6d   :  { %583 = vmatprep.subr.bf16.mxu0 %v582_v59 }
  0x70   :  { %585 = vmatpush3.bf16.msra.mxu0 %v582_v59 }
 0x123   :  { %v447_v51 = vpop.f32.mrb[0].mxu0 }
 0x124   :  { %v172_v52 = vadd.f32 %v447_v51, %v396_v50  ;;  %v166_v53 = vpop.f32.mrb[1].mxu0 }
 0x125   :  { %v167_v54 = vadd.f32 %v396_v50, %v166_v53 }
 0x126   :  { %v176_v56 = vmax.f32 %v172_v52, 0.0 }
 0x127   :  { %v175_v55 = vmax.f32 %v167_v54, 0.0 }
 0x129   :  { %480 = vmatprep.mubr.f32.mxu1 %v175_v55 }
 0x12a   :  { %481 = vmatmul.mubr.f32.vlgmr.msra.gmra.mrb[0].mxu1 %v176_v56 }
 0x1fd   :  { %v482_v61 = vpop.f32.mrb[0].mxu1 }
 0x1fe   :  { %v272_v62 = vadd.f32 %v482_v61, %v399_v60  ;;  %v266_v63 = vpop.f32.mrb[1].mxu1 }
 0x1ff   :  { %v267_v0 = vadd.f32 %v399_v60, %v266_v63 }
 0x200   :  { %v276_v2 = vmax.f32 %v272_v62, 0.0 }
 0x201   :  { %v275_v1 = vmax.f32 %v267_v0, 0.0 }
 0x203   :  { %515 = vmatprep.mubr.f32.mxu0 %v275_v1 }
 0x204   :  { %516 = vmatmul.mubr.f32.vlgmr.msra.gmra.mrb[2].mxu0 %v276_v2 }
 0x2d7   :  { %v517_v4 = vpop.f32.mrb[2].mxu0 }
 0x2d8   :  { %v372_v5 = vadd.f32 %v517_v4, %v400_v3  ;;  %v366_v6 = vpop.f32.mrb[3].mxu0 }
 0x2d9   :  { %v367_v7 = vadd.f32 %v400_v3, %v366_v6 }
 0x2da   :  { %376 = vst [vmem:[#allocation10 + $0x8] sm:$0xff] %v372_v5 }
 0x2db   :  { %375 = vst [vmem:[#allocation10] sm:$0xff] %v367_v7 }
 0x2dc   :  { %692 = shalt.err (!%p689_p8)
}
 0x2dd   :  { %s693_s6 = scalar_lea.hbm %s865_s7, 256 }
 0x2de   :  { %p694_p9 = scmp.ne.s32.totalorder %s865_s7, %s693_s6  ;;  %p697_p10 = scmp.lt.u32.totalorder %s693_s6, %s865_s7 }
 0x2e0   :  { %p699_p11 = pnand %p697_p10, %p694_p9 }
 0x2e2   :  { %702 = shalt.err (!%p699_p11)
}
 0x2e3   :  { %388 = dma.vmem_to_hbm [thread:$0]  %s383_s9, 256, %s865_s7, [#allocation4], %s713_s13, %s713_s13, %s714_s14  }
 0x2e4   :  { %709 = dma.done.wait [#allocation4], 256  }
 0x2e5   :  { %710 = vsyncadd [#allocation4], 4294967040 }
 0x2e6   :  { %392 = vsyncpa [#allocation3], 1 }
 0x2e7   :  { %393 = vsyncpa [#allocation6], 1 }
 0x2e8   :  { %394 = vsyncpa [#allocation9], 1 }
 0x2e9   :  { %395 = vsyncpa [#allocation4], 1 }

// kernel: tpu_custom_call.1
= control target key start
LH: loop header
LB: loop body
LE: loop exit
PB: predicated region body
PF: predicated region fallthrough
CT: control target
= control target key end

     0   :  { %12 = vsyncpa [#allocation3], 0  ;;  %s858_s0 = inlined_call_operand.hbm [shape: f32[16,16], index: 0, kind: input, shape index: {}]   ;;  %s859_s1 = inlined_call_operand.hbm [shape: f32[16,128], index: 1, kind: input, shape index: {}]   ;;  %s860_s2 = inlined_call_operand.vmem [shape: f32[1,128], index: 2, kind: input, shape index: {}]   ;;  %s861_s3 = inlined_call_operand.hbm [shape: f32[128,128], index: 3, kind: input, shape index: {}]   ;;  %s862_s4 = inlined_call_operand.vmem [shape: f32[1,128], index: 4, kind: input, shape index: {}]   ;;  %s863_s5 = inlined_call_operand.hbm [shape: f32[128,128], index: 5, kind: input, shape index: {}]   ;;  %s864_s6 = inlined_call_operand.vmem [shape: f32[1,128], index: 6, kind: input, shape index: {}]   ;;  %s865_s7 = inlined_call_operand.hbm [shape: f32[16,128], index: 7, kind: output, shape index: {}]  }
   0x1   :  { %13 = vsyncpa [#allocation6], 0 }
   0x2   :  { %14 = vsyncpa [#allocation9], 0 }
   0x3   :  { %15 = vsyncpa [#allocation4], 0  ;;  %s711_s24 = smov [#allocation5]   ;;  %s712_s26 = smov [#allocation2]  }
   0x4   :  { %s33_s25 = sshll.u32 %s711_s24, 4  ;;  %s21_s27 = sshll.u32 %s712_s26, 4  ;;  %s34_s25 = int_to_ptr.vmem [resolvable:$true] %s33_s25  ;;  %s758_s27 = int_to_ptr.vmem [resolvable:$true] %s21_s27 }
   0x5   :  { %s593_s30 = scalar_lea.hbm %s859_s1, 256 }
   0x6   :  { %p594_p0 = scmp.ne.s32.totalorder %s859_s1, %s593_s30  ;;  %p597_p1 = scmp.lt.u32.totalorder %s593_s30, %s859_s1 }
   0x8   :  { %p599_p2 = pnand %p597_p1, %p594_p0 }
   0xa   :  { %602 = shalt.err (!%p599_p2)
}
   0xb   :  { %s603_s12 = scalar_lea.vmem %s34_s25, 256  ;;  %p608_p4 = scmp.lt.s32.totalorder %s34_s25, %s34_s25 }
   0xc   :  { %p604_p3 = scmp.ne.s32.totalorder %s34_s25, %s603_s12  ;;  %p609_p5 = scmp.lt.s32.totalorder %s603_s12, %s603_s12 }
   0xe   :  { %p610_p6 = por %p609_p5, %p608_p4 }
  0x10   :  { %p611_p7 = pnand %p610_p6, %p604_p3 }
  0x12   :  { %614 = shalt.err (!%p611_p7)
}
  0x13   :  { %s713_s13 = smov 128   ;;  %s714_s14 = smov 8  }
  0x14   :  { %39 = dma.hbm_to_vmem [thread:$0]  %s859_s1, 256, %s34_s25, [#allocation6], %s713_s13, %s713_s13, %s714_s14  }
  0x15   :  { %s615_s19 = scalar_lea.hbm %s858_s0, 256 }
  0x16   :  { %p616_p8 = scmp.ne.s32.totalorder %s858_s0, %s615_s19  ;;  %p619_p9 = scmp.lt.u32.totalorder %s615_s19, %s858_s0 }
  0x18   :  { %p621_p10 = pnand %p619_p9, %p616_p8 }
  0x1a   :  { %624 = shalt.err (!%p621_p10)
}
  0x1b   :  { %s625_s24 = scalar_lea.vmem %s758_s27, 256  ;;  %p630_p12 = scmp.lt.s32.totalorder %s758_s27, %s758_s27 }
  0x1c   :  { %p626_p11 = scmp.ne.s32.totalorder %s758_s27, %s625_s24  ;;  %p631_p13 = scmp.lt.s32.totalorder %s625_s24, %s625_s24 }
  0x1e   :  { %p632_p0 = por %p631_p13, %p630_p12 }
  0x20   :  { %p633_p1 = pnand %p632_p0, %p626_p11 }
  0x22   :  { %636 = shalt.err (!%p633_p1)
}
  0x23   :  { %27 = dma.hbm_to_vmem [thread:$0]  %s858_s0, 256, %s758_s27, [#allocation3], %s713_s13, %s713_s13, %s714_s14  }
  0x24   :  { %s715_s26 = smov [#allocation7]   ;;  %s716_s29 = smov [#allocation8]  }
  0x25   :  { %s47_s28 = sshll.u32 %s715_s26, 4  ;;  %s61_s30 = sshll.u32 %s716_s29, 4  ;;  %s48_s28 = int_to_ptr.vmem [resolvable:$true] %s47_s28  ;;  %s795_s30 = int_to_ptr.vmem [resolvable:$true] %s61_s30 }
  0x26   :  { %s637_s10 = scalar_lea.hbm %s861_s3, 2048 }
  0x27   :  { %p638_p2 = scmp.ne.s32.totalorder %s861_s3, %s637_s10  ;;  %p641_p3 = scmp.lt.u32.totalorder %s637_s10, %s861_s3 }
  0x29   :  { %p643_p4 = pnand %p641_p3, %p638_p2 }
  0x2b   :  { %646 = shalt.err (!%p643_p4)
}
  0x2c   :  { %s647_s0 = scalar_lea.vmem %s48_s28, 2048  ;;  %p652_p6 = scmp.lt.s32.totalorder %s48_s28, %s48_s28 }
  0x2d   :  { %p648_p5 = scmp.ne.s32.totalorder %s48_s28, %s647_s0  ;;  %p653_p7 = scmp.lt.s32.totalorder %s647_s0, %s647_s0 }
  0x2f   :  { %p654_p8 = por %p653_p7, %p652_p6 }
  0x31   :  { %p655_p9 = pnand %p654_p8, %p648_p5 }
  0x33   :  { %658 = shalt.err (!%p655_p9)
}
  0x34   :  { %53 = dma.hbm_to_vmem [thread:$0]  %s861_s3, 2048, %s48_s28, [#allocation6], %s713_s13, %s713_s13, %s714_s14  }
  0x35   :  { %s659_s20 = scalar_lea.hbm %s863_s5, 2048 }
  0x36   :  { %p660_p10 = scmp.ne.s32.totalorder %s863_s5, %s659_s20  ;;  %p663_p11 = scmp.lt.u32.totalorder %s659_s20, %s863_s5 }
  0x38   :  { %p665_p12 = pnand %p663_p11, %p660_p10 }
  0x3a   :  { %668 = shalt.err (!%p665_p12)
}
  0x3b   :  { %s669_s1 = scalar_lea.vmem %s795_s30, 2048  ;;  %p674_p0 = scmp.lt.s32.totalorder %s795_s30, %s795_s30 }
  0x3c   :  { %p670_p13 = scmp.ne.s32.totalorder %s795_s30, %s669_s1  ;;  %p675_p1 = scmp.lt.s32.totalorder %s669_s1, %s669_s1 }
  0x3e   :  { %p676_p2 = por %p675_p1, %p674_p0 }
  0x40   :  { %p677_p3 = pnand %p676_p2, %p670_p13 }
  0x42   :  { %680 = shalt.err (!%p677_p3)
}
  0x43   :  { %67 = dma.hbm_to_vmem [thread:$0]  %s863_s5, 2048, %s795_s30, [#allocation9], %s713_s13, %s713_s13, %s714_s14  }
  0x44   :  { %703 = dma.done.wait [#allocation3], 256  }
  0x45   :  { %704 = vsyncadd [#allocation3], 4294967040 }
  0x46   :  { %705 = dma.done.wait [#allocation6], 2304  }
  0x47   :  { %706 = vsyncadd [#allocation6], 4294964992 }
  0x48   :  { %707 = dma.done.wait [#allocation9], 2048  }
  0x49   :  { %708 = vsyncadd [#allocation9], 4294965248  ;;  %vm93_vm0 = vcmask 130048   ;;  %v84_v0 = vld [vmem:[#allocation5] sm:$0xff]  ;;  %v85_v1 = vld [vmem:[#allocation5 + $0x8] sm:$0xff]  ;;  %s717_s8 = smov [#allocation10]  }
  0x4a   :  { %v82_v2 = vld [vmem:[#allocation2] sm:$0xff]  ;;  %v518_v3 = vpack.c.bf16 %v85_v1, %v84_v0  ;;  %v178_v5 = vld [vmem:[#allocation7 + $0x8] sm:$0xff]  ;;  %v179_v7 = vld [vmem:[#allocation7 + $0x10] sm:$0xff]  ;;  %s382_s9 = sshll.u32 %s717_s8, 4  ;;  %s383_s9 = int_to_ptr.vmem [resolvable:$true] %s382_s9 }
  0x4b   :  { %445 = vmatprep.mubr.msk.f32.mxu0 %vm93_vm0, %v82_v2  ;;  %v177_v4 = vld [vmem:[#allocation7] sm:$0xff]  ;;  %v180_v8 = vld [vmem:[#allocation7 + $0x18] sm:$0xff]  ;;  %v182_v11 = vld [vmem:[#allocation7 + $0x28] sm:$0xff]  ;;  %p686_p5 = scmp.lt.s32.totalorder %s383_s9, %s383_s9 }
  0x4c   :  { %v522_v6 = vpack.c.bf16 %v178_v5, %v177_v4  ;;  %519 = vmatprep.subr.bf16.mxu0 %v518_v3  ;;  %v526_v9 = vpack.c.bf16 %v180_v8, %v179_v7  ;;  %v181_v10 = vld [vmem:[#allocation7 + $0x20] sm:$0xff]  ;;  %v83_v12 = vld [vmem:[#allocation2 + $0x8] sm:$0xff]  ;;  %v183_v14 = vld [vmem:[#allocation7 + $0x30] sm:$0xff] }
  0x4d   :  { %521 = vmatpush3.bf16.msra.mxu0 %v518_v3  ;;  %v530_v13 = vpack.c.bf16 %v182_v11, %v181_v10  ;;  %v184_v15 = vld [vmem:[#allocation7 + $0x38] sm:$0xff]  ;;  %v185_v17 = vld [vmem:[#allocation7 + $0x40] sm:$0xff]  ;;  %v186_v18 = vld [vmem:[#allocation7 + $0x48] sm:$0xff] }
  0x4e   :  { %523 = vmatprep.subr.bf16.mxu1 %v522_v6  ;;  %v534_v16 = vpack.c.bf16 %v184_v15, %v183_v14  ;;  %v538_v19 = vpack.c.bf16 %v186_v18, %v185_v17  ;;  %v187_v20 = vld [vmem:[#allocation7 + $0x50] sm:$0xff]  ;;  %v188_v21 = vld [vmem:[#allocation7 + $0x58] sm:$0xff]  ;;  %v189_v23 = vld [vmem:[#allocation7 + $0x60] sm:$0xff] }
  0x4f   :  { %525 = vmatpush3.bf16.msra.mxu1 %v522_v6  ;;  %v542_v22 = vpack.c.bf16 %v188_v21, %v187_v20  ;;  %v190_v24 = vld [vmem:[#allocation7 + $0x68] sm:$0xff]  ;;  %v191_v26 = vld [vmem:[#allocation7 + $0x70] sm:$0xff]  ;;  %v192_v27 = vld [vmem:[#allocation7 + $0x78] sm:$0xff] }
  0x50   :  { %527 = vmatprep.subr.bf16.mxu1 %v526_v9  ;;  %446 = vmatmul.mubr.msk.f32.vlgmr.msra.gmra.mrb[0].mxu0 %vm93_vm0, %v83_v12  ;;  %v546_v25 = vpack.c.bf16 %v190_v24, %v189_v23  ;;  %v550_v28 = vpack.c.bf16 %v192_v27, %v191_v26  ;;  %v277_v29 = vld [vmem:[#allocation8] sm:$0xff]  ;;  %v278_v30 = vld [vmem:[#allocation8 + $0x8] sm:$0xff]  ;;  %v279_v31 = vld [vmem:[#allocation8 + $0x10] sm:$0xff] }
  0x51   :  { %v554_v32 = vpack.c.bf16 %v278_v30, %v277_v29  ;;  %v280_v33 = vld [vmem:[#allocation8 + $0x18] sm:$0xff]  ;;  %v281_v35 = vld [vmem:[#allocation8 + $0x20] sm:$0xff]  ;;  %v282_v36 = vld [vmem:[#allocation8 + $0x28] sm:$0xff] }
  0x52   :  { %v558_v34 = vpack.c.bf16 %v280_v33, %v279_v31  ;;  %v562_v37 = vpack.c.bf16 %v282_v36, %v281_v35  ;;  %v283_v38 = vld [vmem:[#allocation8 + $0x30] sm:$0xff]  ;;  %v284_v39 = vld [vmem:[#allocation8 + $0x38] sm:$0xff]  ;;  %v285_v41 = vld [vmem:[#allocation8 + $0x40] sm:$0xff] }
  0x53   :  { %529 = vmatpush3.bf16.msra.mxu1 %v526_v9  ;;  %555 = vmatprep.subr.bf16.mxu0 %v554_v32  ;;  %v566_v40 = vpack.c.bf16 %v284_v39, %v283_v38  ;;  %v286_v42 = vld [vmem:[#allocation8 + $0x48] sm:$0xff]  ;;  %v287_v44 = vld [vmem:[#allocation8 + $0x50] sm:$0xff]  ;;  %v288_v45 = vld [vmem:[#allocation8 + $0x58] sm:$0xff] }
  0x54   :  { %531 = vmatprep.subr.bf16.mxu1 %v530_v13  ;;  %557 = vmatpush3.bf16.msra.mxu0 %v554_v32  ;;  %v570_v43 = vpack.c.bf16 %v286_v42, %v285_v41  ;;  %v574_v46 = vpack.c.bf16 %v288_v45, %v287_v44  ;;  %v289_v47 = vld [vmem:[#allocation8 + $0x60] sm:$0xff]  ;;  %v290_v48 = vld [vmem:[#allocation8 + $0x68] sm:$0xff]  ;;  %v291_v57 = vld [vmem:[#allocation8 + $0x70] sm:$0xff] }
  0x55   :  { %559 = vmatprep.subr.bf16.mxu0 %v558_v34  ;;  %v578_v49 = vpack.c.bf16 %v290_v48, %v289_v47  ;;  %v396_v50 = vld [vmem:[%s860_s2] ss:$0 sm:$0xff]  ;;  %v292_v58 = vld [vmem:[#allocation8 + $0x78] sm:$0xff] }
  0x56   :  { %v582_v59 = vpack.c.bf16 %v292_v58, %v291_v57  ;;  %v399_v60 = vld [vmem:[%s862_s4] ss:$0 sm:$0xff]  ;;  %s681_s4 = scalar_lea.vmem %s383_s9, 256 }
  0x57   :  { %533 = vmatpush3.bf16.msra.mxu1 %v530_v13  ;;  %v400_v3 = vld [vmem:[%s864_s6] ss:$0 sm:$0xff]  ;;  %p682_p4 = scmp.ne.s32.totalorder %s383_s9, %s681_s4  ;;  %p687_p6 = scmp.lt.s32.totalorder %s681_s4, %s681_s4 }
  0x58   :  { %535 = vmatprep.subr.bf16.mxu1 %v534_v16  ;;  %561 = vmatpush3.bf16.msra.mxu0 %v558_v34 }
  0x59   :  { %563 = vmatprep.subr.bf16.mxu0 %v562_v37  ;;  %p688_p7 = por %p687_p6, %p686_p5 }
  0x5b   :  { %537 = vmatpush3.bf16.msra.mxu1 %v534_v16  ;;  %p689_p8 = pnand %p688_p7, %p682_p4 }
  0x5c   :  { %539 = vmatprep.subr.bf16.mxu1 %v538_v19  ;;  %565 = vmatpush3.bf16.msra.mxu0 %v562_v37 }
  0x5d   :  { %567 = vmatprep.subr.bf16.mxu0 %v566_v40 }
  0x5f   :  { %541 = vmatpush3.bf16.msra.mxu1 %v538_v19 }
  0x60   :  { %543 = vmatprep.subr.bf16.mxu1 %v542_v22  ;;  %569 = vmatpush3.bf16.msra.mxu0 %v566_v40 }
  0x61   :  { %571 = vmatprep.subr.bf16.mxu0 %v570_v43 }
  0x63   :  { %545 = vmatpush3.bf16.msra.mxu1 %v542_v22 }
  0x64   :  { %547 = vmatprep.subr.bf16.mxu1 %v546_v25  ;;  %573 = vmatpush3.bf16.msra.mxu0 %v570_v43 }
  0x65   :  { %575 = vmatprep.subr.bf16.mxu0 %v574_v46 }
  0x67   :  { %549 = vmatpush3.bf16.msra.mxu1 %v546_v25 }
  0x68   :  { %551 = vmatprep.subr.bf16.mxu1 %v550_v28  ;;  %577 = vmatpush3.bf16.msra.mxu0 %v574_v46 }
  0x69   :  { %579 = vmatprep.subr.bf16.mxu0 %v578_v49 }
  0x6b   :  { %553 = vmatpush3.bf16.msra.mxu1 %v550_v28 }
  0x6c   :  { %581 = vmatpush3.bf16.msra.mxu0 %v578_v49 }
  0x6d   :  { %583 = vmatprep.subr.bf16.mxu0 %v582_v59 }
  0x70   :  { %585 = vmatpush3.bf16.msra.mxu0 %v582_v59 }
 0x123   :  { %v447_v51 = vpop.f32.mrb[0].mxu0 }
 0x124   :  { %v172_v52 = vadd.f32 %v447_v51, %v396_v50  ;;  %v166_v53 = vpop.f32.mrb[1].mxu0 }
 0x125   :  { %v167_v54 = vadd.f32 %v396_v50, %v166_v53 }
 0x126   :  { %v176_v56 = vmax.f32 %v172_v52, 0.0 }
 0x127   :  { %v175_v55 = vmax.f32 %v167_v54, 0.0 }
 0x129   :  { %480 = vmatprep.mubr.f32.mxu1 %v175_v55 }
 0x12a   :  { %481 = vmatmul.mubr.f32.vlgmr.msra.gmra.mrb[0].mxu1 %v176_v56 }
 0x1fd   :  { %v482_v61 = vpop.f32.mrb[0].mxu1 }
 0x1fe   :  { %v272_v62 = vadd.f32 %v482_v61, %v399_v60  ;;  %v266_v63 = vpop.f32.mrb[1].mxu1 }
 0x1ff   :  { %v267_v0 = vadd.f32 %v399_v60, %v266_v63 }
 0x200   :  { %v276_v2 = vmax.f32 %v272_v62, 0.0 }
 0x201   :  { %v275_v1 = vmax.f32 %v267_v0, 0.0 }
 0x203   :  { %515 = vmatprep.mubr.f32.mxu0 %v275_v1 }
 0x204   :  { %516 = vmatmul.mubr.f32.vlgmr.msra.gmra.mrb[2].mxu0 %v276_v2 }
 0x2d7   :  { %v517_v4 = vpop.f32.mrb[2].mxu0 }
 0x2d8   :  { %v372_v5 = vadd.f32 %v517_v4, %v400_v3  ;;  %v366_v6 = vpop.f32.mrb[3].mxu0 }
 0x2d9   :  { %v367_v7 = vadd.f32 %v400_v3, %v366_v6 }
 0x2da   :  { %376 = vst [vmem:[#allocation10 + $0x8] sm:$0xff] %v372_v5 }
 0x2db   :  { %375 = vst [vmem:[#allocation10] sm:$0xff] %v367_v7 }
 0x2dc   :  { %692 = shalt.err (!%p689_p8)
}
 0x2dd   :  { %s693_s6 = scalar_lea.hbm %s865_s7, 256 }
 0x2de   :  { %p694_p9 = scmp.ne.s32.totalorder %s865_s7, %s693_s6  ;;  %p697_p10 = scmp.lt.u32.totalorder %s693_s6, %s865_s7 }
 0x2e0   :  { %p699_p11 = pnand %p697_p10, %p694_p9 }
 0x2e2   :  { %702 = shalt.err (!%p699_p11)
}
 0x2e3   :  { %388 = dma.vmem_to_hbm [thread:$0]  %s383_s9, 256, %s865_s7, [#allocation4], %s713_s13, %s713_s13, %s714_s14  }
 0x2e4   :  { %709 = dma.done.wait [#allocation4], 256  }
 0x2e5   :  { %710 = vsyncadd [#allocation4], 4294967040 }
 0x2e6   :  { %392 = vsyncpa [#allocation3], 1 }
 0x2e7   :  { %393 = vsyncpa [#allocation6], 1 }
 0x2e8   :  { %394 = vsyncpa [#allocation9], 1 }
 0x2e9   :  { %395 = vsyncpa [#allocation4], 1 }

</bundles_post_ra>
